<compile_context>
chip_gen: v7x
topology: tpu7x:2x2x1
jax: 0.10.0
libtpu: 0.0.40
codegen_flags: <defaults>
</compile_context>

<pallas_src>
import functools

import jax
import jax.numpy as jnp
import numpy as np
from jax.experimental import pallas as pl
from jax.experimental.pallas import tpu as pltpu


def _gaug_loss_kernel(rec_ref, tgt_ref, out_ref,
                      s1_ref, s2_ref, ssum_ref, *, total_elems):
    # rec_ref: (tc, tm) tile of adj_rec[:C, :R]   (transposed pairing vs tgt)
    # tgt_ref: (tm, tc) tile of adj_tgt
    # out_ref: (1, 1)   scalar loss (written only on the final grid step)
    # s*_ref : (1, tc)  lane-parallel running partial sums (VMEM scratch)
    i = pl.program_id(0)
    j = pl.program_id(1)

    @pl.when((i == 0) & (j == 0))
    def _():
        s1_ref[...] = jnp.zeros_like(s1_ref)
        s2_ref[...] = jnp.zeros_like(s2_ref)
        ssum_ref[...] = jnp.zeros_like(ssum_ref)

    # x[a, b] = adj_rec[j*tc + b, i*tm + a]  == (adj_rec[:C, :R].T) at tgt position
    x = jnp.transpose(rec_ref[...], (1, 0))          # (tm, tc), XLU transpose
    y = tgt_ref[...]                                  # (tm, tc)

    # stable softplus(-x) = max(-x, 0) + log(1 + exp(-|x|))   (EUP exp/log)
    sp = jnp.maximum(-x, 0.0) + jnp.log(1.0 + jnp.exp(-jnp.abs(x)))

    t1 = (1.0 - y) * x + sp                            # pos_weight-independent part
    t2 = y * sp                                        # scaled by (pos_weight - 1)

    # sublane reduction only; keep lanes parallel until the end.
    s1_ref[...] += jnp.sum(t1, axis=0, keepdims=True)
    s2_ref[...] += jnp.sum(t2, axis=0, keepdims=True)
    ssum_ref[...] += jnp.sum(y, axis=0, keepdims=True)

    @pl.when((i == pl.num_programs(0) - 1) & (j == pl.num_programs(1) - 1))
    def _():
        s1 = jnp.sum(s1_ref[...], axis=1, keepdims=True)       # (1, 1)
        s2 = jnp.sum(s2_ref[...], axis=1, keepdims=True)       # (1, 1)
        adj_sum = jnp.sum(ssum_ref[...], axis=1, keepdims=True)  # (1, 1)

        neg = total_elems - adj_sum                   # number of zero entries
        pos_weight = neg / adj_sum
        norm_w = total_elems / (2.0 * neg)
        mean_loss = (s1 + (pos_weight - 1.0) * s2) / total_elems
        out_ref[...] = (norm_w * mean_loss).astype(out_ref.dtype)


def gaug_loss(adj_rec, adj_tgt, *, tm=128, tc=128):
    """Pallas implementation of GaugLoss.forward (dense adj_tgt branch)."""
    R, C = adj_tgt.shape
    rec = adj_rec[:C, :R].astype(jnp.float32)          # static slice, no-op when shapes match
    tgt = adj_tgt.astype(jnp.float32)

    tm = min(tm, R)
    tc = min(tc, C)
    assert R % tm == 0 and C % tc == 0, "R, C must be divisible by the tile sizes"

    out = pl.pallas_call(
        functools.partial(_gaug_loss_kernel, total_elems=float(R * C)),
        out_shape=jax.ShapeDtypeStruct((1, 1), jnp.float32),
        grid_spec=pltpu.PrefetchScalarGridSpec(
            num_scalar_prefetch=0,
            grid=(R // tm, C // tc),
            in_specs=[
                # adj_rec[:C,:R] tile at (row-block j, col-block i): the transposed pairing.
                pl.BlockSpec((tc, tm), lambda i, j: (j, i)),
                # adj_tgt tile at (i, j).
                pl.BlockSpec((tm, tc), lambda i, j: (i, j)),
            ],
            out_specs=pl.BlockSpec((1, 1), lambda i, j: (0, 0)),
            scratch_shapes=[
                pltpu.VMEM((1, tc), jnp.float32),   # S1
                pltpu.VMEM((1, tc), jnp.float32),   # S2
                pltpu.VMEM((1, tc), jnp.float32),   # sum(y)
            ],
        ),
        compiler_params=pltpu.CompilerParams(
            # Both grid axes feed the running reduction -> must be "arbitrary".
            dimension_semantics=("arbitrary", "arbitrary")),
    )(rec, tgt)
    return out[0, 0]


def reference_gaug_loss(adj_rec, adj_tgt):
    """Pure-JAX mirror of the PyTorch module (dense branch)."""
    R, C = adj_tgt.shape
    total = float(R * C)
    adj_sum = jnp.sum(adj_tgt)
    pos_weight = (total - adj_sum) / adj_sum
    norm_w = total / ((total - adj_sum) * 2.0)

    logits = jnp.transpose(adj_rec[:C, :R])            # (R, C)
    y = adj_tgt
    sp = jnp.maximum(-logits, 0.0) + jnp.log1p(jnp.exp(-jnp.abs(logits)))
    loss_el = (1.0 - y) * logits + (1.0 + (pos_weight - 1.0) * y) * sp
    return norm_w * jnp.mean(loss_el)


if __name__ == "__main__":
    key = jax.random.PRNGKey(0)
    k_rec, k_tgt = jax.random.split(key)

    # Small but non-trivial: 256x256 -> a 2x2 grid of 128x128 lane-dense tiles,
    # which exercises the init / accumulate / finalize path.
    N = 256
    adj_rec = jax.random.normal(k_rec, (N, N), jnp.float32)                    # reconstruction logits
    adj_tgt = (jax.random.uniform(k_tgt, (N, N)) > 0.9).astype(jnp.float32)    # sparse binary adjacency

    # TODO(synk): the torch.sparse adj_tgt branch has no Pallas equivalent; densify before calling.
    loss = gaug_loss(adj_rec, adj_tgt)
    loss = jax.block_until_ready(loss)

    loss_ref = reference_gaug_loss(adj_rec, adj_tgt)
    np.testing.assert_allclose(np.asarray(loss), np.asarray(loss_ref),
                               rtol=1e-4, atol=1e-6)
    print("KERNEL_OK")
</pallas_src>

<mosaic_0001>
module attributes {stable_mosaic.version = 11 : i64} {
  func.func @_gaug_loss_kernel(%arg0: i32, %arg1: i32, %arg2: memref<128x128xf32, #tpu.memory_space<vmem>>, %arg3: memref<128x128xf32, #tpu.memory_space<vmem>>, %arg4: memref<1x1xf32, #tpu.memory_space<vmem>>, %arg5: memref<1x128xf32, #tpu.memory_space<vmem>>, %arg6: memref<1x128xf32, #tpu.memory_space<vmem>>, %arg7: memref<1x128xf32, #tpu.memory_space<vmem>>) attributes {dimension_semantics = [#tpu.dimension_semantics<arbitrary>, #tpu.dimension_semantics<arbitrary>], iteration_bounds = array<i64: 2, 2>, scalar_prefetch = 0 : i64, scratch_operands = 3 : i64, tpu.core_type = #tpu.core_type<tc>, window_params = [{transform_indices = @transform_0, window_bounds = array<i64: 128, 128>}, {transform_indices = @transform_1, window_bounds = array<i64: 128, 128>}, {pipeline_mode = #tpu.pipeline_mode<synchronous>, transform_indices = @transform_2, window_bounds = array<i64: 1, 1>}]} {
    %c0_i32 = arith.constant 0 : i32
    %0 = arith.cmpi eq, %arg0, %c0_i32 : i32
    %c0_i32_0 = arith.constant 0 : i32
    %1 = arith.cmpi eq, %arg1, %c0_i32_0 : i32
    %2 = arith.andi %0, %1 : i1
    %3 = arith.extui %2 : i1 to i32
    %c0_i32_1 = arith.constant 0 : i32
    %4 = arith.cmpi ne, %3, %c0_i32_1 : i32
    scf.if %4 {
      %cst_26 = arith.constant 0.000000e+00 : f32
      %45 = vector.broadcast %cst_26 : f32 to vector<1x128xf32>
      %c0_27 = arith.constant 0 : index
      %c0_28 = arith.constant 0 : index
      %46 = vector.load %arg5[%c0_27, %c0_28] : memref<1x128xf32, #tpu.memory_space<vmem>>, vector<1x128xf32>
      tpu.vector_store %arg5[%c0_27, %c0_28], %45 {strides = array<i32>} : memref<1x128xf32, #tpu.memory_space<vmem>>, vector<1x128xf32>,
      %cst_29 = arith.constant 0.000000e+00 : f32
      %47 = vector.broadcast %cst_29 : f32 to vector<1x128xf32>
      %c0_30 = arith.constant 0 : index
      %c0_31 = arith.constant 0 : index
      %48 = vector.load %arg6[%c0_30, %c0_31] : memref<1x128xf32, #tpu.memory_space<vmem>>, vector<1x128xf32>
      tpu.vector_store %arg6[%c0_30, %c0_31], %47 {strides = array<i32>} : memref<1x128xf32, #tpu.memory_space<vmem>>, vector<1x128xf32>,
      %cst_32 = arith.constant 0.000000e+00 : f32
      %49 = vector.broadcast %cst_32 : f32 to vector<1x128xf32>
      %c0_33 = arith.constant 0 : index
      %c0_34 = arith.constant 0 : index
      %50 = vector.load %arg7[%c0_33, %c0_34] : memref<1x128xf32, #tpu.memory_space<vmem>>, vector<1x128xf32>
      tpu.vector_store %arg7[%c0_33, %c0_34], %49 {strides = array<i32>} : memref<1x128xf32, #tpu.memory_space<vmem>>, vector<1x128xf32>,
    } else {
    }
    %c0 = arith.constant 0 : index
    %c0_2 = arith.constant 0 : index
    %5 = vector.load %arg2[%c0, %c0_2] : memref<128x128xf32, #tpu.memory_space<vmem>>, vector<128x128xf32>
    %6 = tpu.transpose %5, [1, 0] : vector<128x128xf32> -> vector<128x128xf32>
    %c0_3 = arith.constant 0 : index
    %c0_4 = arith.constant 0 : index
    %7 = vector.load %arg3[%c0_3, %c0_4] : memref<128x128xf32, #tpu.memory_space<vmem>>, vector<128x128xf32>
    %cst = arith.constant 0.000000e+00 : f32
    %8 = vector.broadcast %cst : f32 to vector<128x128xf32>
    %9 = arith.subf %8, %6 : vector<128x128xf32>
    %cst_5 = arith.constant 0.000000e+00 : f32
    %10 = vector.broadcast %cst_5 : f32 to vector<128x128xf32>
    %11 = arith.maximumf %9, %10 : vector<128x128xf32>
    %12 = math.absf %6 : vector<128x128xf32>
    %cst_6 = arith.constant 0.000000e+00 : f32
    %13 = vector.broadcast %cst_6 : f32 to vector<128x128xf32>
    %14 = arith.subf %13, %12 : vector<128x128xf32>
    %15 = math.exp %14 : vector<128x128xf32>
    %cst_7 = arith.constant 1.000000e+00 : f32
    %16 = vector.broadcast %cst_7 : f32 to vector<128x128xf32>
    %17 = arith.addf %16, %15 : vector<128x128xf32>
    %18 = math.log %17 : vector<128x128xf32>
    %19 = arith.addf %11, %18 : vector<128x128xf32>
    %cst_8 = arith.constant 1.000000e+00 : f32
    %20 = vector.broadcast %cst_8 : f32 to vector<128x128xf32>
    %21 = arith.subf %20, %7 : vector<128x128xf32>
    %22 = arith.mulf %21, %6 : vector<128x128xf32>
    %23 = arith.addf %22, %19 : vector<128x128xf32>
    %24 = arith.mulf %7, %19 : vector<128x128xf32>
    %c0_9 = arith.constant 0 : index
    %c0_10 = arith.constant 0 : index
    %25 = vector.load %arg5[%c0_9, %c0_10] : memref<1x128xf32, #tpu.memory_space<vmem>>, vector<1x128xf32>
    %cst_11 = arith.constant dense<0.000000e+00> : vector<128xf32>
    %26 = vector.multi_reduction <add>, %23, %cst_11 [0] : vector<128x128xf32> to vector<128xf32>
    %27 = vector.shape_cast %26 : vector<128xf32> to vector<1x128xf32>
    %28 = arith.addf %25, %27 : vector<1x128xf32>
    %c0_12 = arith.constant 0 : index
    %c0_13 = arith.constant 0 : index
    %29 = vector.load %arg5[%c0_12, %c0_13] : memref<1x128xf32, #tpu.memory_space<vmem>>, vector<1x128xf32>
    tpu.vector_store %arg5[%c0_12, %c0_13], %28 {strides = array<i32>} : memref<1x128xf32, #tpu.memory_space<vmem>>, vector<1x128xf32>,
    %c0_14 = arith.constant 0 : index
    %c0_15 = arith.constant 0 : index
    %30 = vector.load %arg6[%c0_14, %c0_15] : memref<1x128xf32, #tpu.memory_space<vmem>>, vector<1x128xf32>
    %cst_16 = arith.constant dense<0.000000e+00> : vector<128xf32>
    %31 = vector.multi_reduction <add>, %24, %cst_16 [0] : vector<128x128xf32> to vector<128xf32>
    %32 = vector.shape_cast %31 : vector<128xf32> to vector<1x128xf32>
    %33 = arith.addf %30, %32 : vector<1x128xf32>
    %c0_17 = arith.constant 0 : index
    %c0_18 = arith.constant 0 : index
    %34 = vector.load %arg6[%c0_17, %c0_18] : memref<1x128xf32, #tpu.memory_space<vmem>>, vector<1x128xf32>
    tpu.vector_store %arg6[%c0_17, %c0_18], %33 {strides = array<i32>} : memref<1x128xf32, #tpu.memory_space<vmem>>, vector<1x128xf32>,
    %c0_19 = arith.constant 0 : index
    %c0_20 = arith.constant 0 : index
    %35 = vector.load %arg7[%c0_19, %c0_20] : memref<1x128xf32, #tpu.memory_space<vmem>>, vector<1x128xf32>
    %cst_21 = arith.constant dense<0.000000e+00> : vector<128xf32>
    %36 = vector.multi_reduction <add>, %7, %cst_21 [0] : vector<128x128xf32> to vector<128xf32>
    %37 = vector.shape_cast %36 : vector<128xf32> to vector<1x128xf32>
    %38 = arith.addf %35, %37 : vector<1x128xf32>
    %c0_22 = arith.constant 0 : index
    %c0_23 = arith.constant 0 : index
    %39 = vector.load %arg7[%c0_22, %c0_23] : memref<1x128xf32, #tpu.memory_space<vmem>>, vector<1x128xf32>
    tpu.vector_store %arg7[%c0_22, %c0_23], %38 {strides = array<i32>} : memref<1x128xf32, #tpu.memory_space<vmem>>, vector<1x128xf32>,
    %c1_i32 = arith.constant 1 : i32
    %40 = arith.cmpi eq, %arg0, %c1_i32 : i32
    %c1_i32_24 = arith.constant 1 : i32
    %41 = arith.cmpi eq, %arg1, %c1_i32_24 : i32
    %42 = arith.andi %40, %41 : i1
    %43 = arith.extui %42 : i1 to i32
    %c0_i32_25 = arith.constant 0 : i32
    %44 = arith.cmpi ne, %43, %c0_i32_25 : i32
    scf.if %44 {
      %c0_26 = arith.constant 0 : index
      %c0_27 = arith.constant 0 : index
      %45 = vector.load %arg5[%c0_26, %c0_27] : memref<1x128xf32, #tpu.memory_space<vmem>>, vector<1x128xf32>
      %cst_28 = arith.constant dense<0.000000e+00> : vector<1xf32>
      %46 = vector.multi_reduction <add>, %45, %cst_28 [1] : vector<1x128xf32> to vector<1xf32>
      %47 = vector.shape_cast %46 : vector<1xf32> to vector<1x1xf32>
      %c0_29 = arith.constant 0 : index
      %c0_30 = arith.constant 0 : index
      %48 = vector.load %arg6[%c0_29, %c0_30] : memref<1x128xf32, #tpu.memory_space<vmem>>, vector<1x128xf32>
      %cst_31 = arith.constant dense<0.000000e+00> : vector<1xf32>
      %49 = vector.multi_reduction <add>, %48, %cst_31 [1] : vector<1x128xf32> to vector<1xf32>
      %50 = vector.shape_cast %49 : vector<1xf32> to vector<1x1xf32>
      %c0_32 = arith.constant 0 : index
      %c0_33 = arith.constant 0 : index
      %51 = vector.load %arg7[%c0_32, %c0_33] : memref<1x128xf32, #tpu.memory_space<vmem>>, vector<1x128xf32>
      %cst_34 = arith.constant dense<0.000000e+00> : vector<1xf32>
      %52 = vector.multi_reduction <add>, %51, %cst_34 [1] : vector<1x128xf32> to vector<1xf32>
      %53 = vector.shape_cast %52 : vector<1xf32> to vector<1x1xf32>
      %cst_35 = arith.constant 6.553600e+04 : f32
      %54 = vector.broadcast %cst_35 : f32 to vector<1x1xf32>
      %55 = arith.subf %54, %53 : vector<1x1xf32>
      %56 = arith.divf %55, %53 : vector<1x1xf32>
      %cst_36 = arith.constant 2.000000e+00 : f32
      %57 = vector.broadcast %cst_36 : f32 to vector<1x1xf32>
      %58 = arith.mulf %57, %55 : vector<1x1xf32>
      %cst_37 = arith.constant 6.553600e+04 : f32
      %59 = vector.broadcast %cst_37 : f32 to vector<1x1xf32>
      %60 = arith.divf %59, %58 : vector<1x1xf32>
      %cst_38 = arith.constant 1.000000e+00 : f32
      %61 = vector.broadcast %cst_38 : f32 to vector<1x1xf32>
      %62 = arith.subf %56, %61 : vector<1x1xf32>
      %63 = arith.mulf %62, %50 : vector<1x1xf32>
      %64 = arith.addf %47, %63 : vector<1x1xf32>
      %cst_39 = arith.constant 6.553600e+04 : f32
      %65 = vector.broadcast %cst_39 : f32 to vector<1x1xf32>
      %66 = arith.divf %64, %65 : vector<1x1xf32>
      %67 = arith.mulf %60, %66 : vector<1x1xf32>
      %c0_40 = arith.constant 0 : index
      %c0_41 = arith.constant 0 : index
      %68 = vector.load %arg4[%c0_40, %c0_41] : memref<1x1xf32, #tpu.memory_space<vmem>>, vector<1x1xf32>
      tpu.vector_store %arg4[%c0_40, %c0_41], %67 {strides = array<i32>} : memref<1x1xf32, #tpu.memory_space<vmem>>, vector<1x1xf32>,
    } else {
    }
    return
  }
  func.func @transform_0(%arg0: i32, %arg1: i32) -> (i32, i32) {
    %c0_i32 = arith.constant 0 : i32
    return %arg1, %arg0 : i32, i32
  }
  func.func @transform_1(%arg0: i32, %arg1: i32) -> (i32, i32) {
    %c0_i32 = arith.constant 0 : i32
    return %arg0, %arg1 : i32, i32
  }
  func.func @transform_2(%arg0: i32, %arg1: i32) -> (i32, i32) {
    %c0_i32 = arith.constant 0 : i32
    %c0_i32_0 = arith.constant 0 : i32
    %c0_i32_1 = arith.constant 0 : i32
    return %c0_i32, %c0_i32_0 : i32, i32
  }
}

</mosaic_0001>

<bundles_post_ra>
// kernel: tpu_custom_call.1
= control target key start
LH: loop header
LB: loop body
LE: loop exit
PB: predicated region body
PF: predicated region fallthrough
CT: control target
= control target key end

     0   :  { %s1556_s0 = inlined_call_operand.hbm [shape: f32[256,256], index: 0, kind: input, shape index: {}]   ;;  %s1557_s1 = inlined_call_operand.hbm [shape: f32[256,256], index: 1, kind: input, shape index: {}]   ;;  %s1558_s2 = inlined_call_operand.hbm [shape: f32[1,1], index: 2, kind: output, shape index: {}]  }
   0x1   :  { %1561 = sst [smem:[#allocation14_spill]] %s1556_s0 }
   0x2   :  { %7 = vsyncpa [#allocation6], 0 }
   0x3   :  { %9 = vsyncpa [#allocation6 + $0x1], 0 }
   0x4   :  { %10 = vsyncpa [#allocation9], 0 }
   0x5   :  { %12 = vsyncpa [#allocation9 + $0x1], 0 }
   0x6   :  { %13 = vsyncpa [#allocation7], 0  ;;  %s1070_s9 = smov 0   ;;  %s1072_s10 = smov 0  }
   0x7   :  { %s1074_s11 = smov 0   ;;  %s1076_s12 = smov 0  }
   0x8   :  { %s1078_s13 = smov 0   ;;  %s1080_s14 = smov 0  }
   0x9   :  { %s1082_s15 = smov 0   ;;  %s1084_s16 = smov 0  }
   0xa LB: > { %s1559_s17 = sadd.s32 4294967295, %s1046_s16   ;;  %s28_s18 = sadd.s32 1, %s1038_s14  ;;  %s1046_s16 = sphi %s1084_s16, %s19_s16   ;;  %s1042_s15 = sphi %s1082_s15, %s1582_s15   ;;  %s1038_s14 = sphi %s1080_s14, %s1581_s14   ;;  %s1034_s13 = sphi %s1078_s13, %s1580_s13   ;;  %s1030_s12 = sphi %s1076_s12, %s1579_s12   ;;  %s1026_s11 = sphi %s1074_s11, %s1578_s11   ;;  %s1022_s10 = sphi %s1072_s10, %s1577_s10   ;;  %s1018_s9 = sphi %s1070_s9, %s1576_s9  }
   0xb   : > { %p29_p0 = scmp.ge.s32.totalorder %s28_s18, 2  ;;  %s31_s19 = sadd.s32 1, %s1042_s15 }
   0xc   : > { %s40_s20 = sadd.s32 1, %s1026_s11  ;;  %p47_p1 = scmp.ne.s32.totalorder %s1026_s11, %s1022_s10 }
   0xd   : > { %s1584_s18 = smov (%p29_p0, %s28_s18), 0  ;;  %s1586_s19 = smov (!%p29_p0, %s31_s19), %s1042_s15 }
   0xe   : > { %s35_s21 = ssub.s32 %s1038_s14, %s1584_s18  ;;  %p48_p2 = scmp.eq.s32.totalorder %s1046_s16, 0 }
   0xf   : > { %p33_p3 = scmp.ge.s32.totalorder %s1586_s19, 2  ;;  %p53_p4 = scmp.ne.s32.totalorder %s1022_s10, %s1018_s9 }
  0x10   : > { %p1121_p5 = por %p48_p2, %p47_p1  ;;  %p54_p6 = scmp.eq.s32.totalorder %s1559_s17, 0 }
  0x11   : > { %s1588_s19 = smov (%p33_p3, %s1586_s19), 0  ;;  %p746_p8 = scmp.lt.s32.totalorder %s1046_s16, 4 }
  0x12   : > { %p1129_p7 = por %p54_p6, %p53_p4  ;;  %s36_s24 = ssub.s32 %s1042_s15, %s1588_s19 }
  0x13   : > { %s37_s25 = sor.u32 %s36_s24, %s35_s21  ;;  %s1137_s26 = sand.u32 1, %s1026_s11  }
  0x14   : > { %s1563_s23 = scalar_select %p1129_p7, 1, 0 }
  0x15   : > { %p38_p9 = scmp.eq.s32.totalorder %s37_s25, 0  ;;  %s713_s27 = sshll.u32 %s1137_s26, 7 }
  0x16   : > { %s729_s28 = sshll.u32 %s1038_s14, 5  ;;  %s130_s4 = scalar_lea.vmem [#allocation5], %s713_s27 }
  0x17   : > { %s1142_s29 = scalar_select %p38_p9, %s1026_s11, %s40_s20  }
  0x18   : > { %s136_s30 = sadd.s32 %s1042_s15, %s729_s28  ;;  %s139_s5 = sshll.u32 %s130_s4, 4  ;;  %s1152_s5 = int_to_ptr.vmem [resolvable:$true] %s139_s5 }
  0x19   : > { %s716_s3 = sshll.u32 %s136_s30, 7  ;;  %s1564_s0 = sld [smem:[#allocation14_spill]] }
  0x1a   : > { %p1158_p10 = pnand %p746_p8, %p1121_p5  ;;  %s127_s20 = scalar_lea.sflag [#allocation6], %s1137_s26 }
  0x1c   : > { %p888_p13 = pneg %p1158_p10 }
  0x1f   : > { %s1150_s8 = scalar_lea.hbm %s1564_s0, %s716_s3  ;;  %s891_s22 = scalar_lea.hbm %s1564_s0, 8192 }
  0x20   : > { %s886_s21 = scalar_lea.hbm %s1150_s8, 2048  ;;  %p892_p2 = scmp.lt.u32.totalorder %s1150_s8, %s1564_s0 }
  0x21   : > { %p887_p12 = scmp.ne.s32.totalorder %s1150_s8, %s886_s21  ;;  %p893_p3 = scmp.lt.u32.totalorder %s891_s22, %s886_s21 }
  0x22   : > { %p895_p5 = scmp.lt.u32.totalorder %s886_s21, %s1150_s8 }
  0x23   : > { %p889_p0 = pnand %p888_p13, %p887_p12  ;;  %p894_p4 = por %p893_p3, %p892_p2 }
  0x25   : > { %p890_p1 = pneg %p889_p0  ;;  %p896_p6 = por %p895_p5, %p894_p4 }
  0x27   : > { %p897_p8 = pnand %p896_p6, %p890_p1 }
  0x29   : > { %900 = shalt.err (!%p897_p8)
}
  0x2a   : > { %s901_s3 = scalar_lea.vmem %s1152_s5, 2048  ;;  %s1048_s4 = smov [#allocation5]  }
  0x2b   : > { %p902_p9 = scmp.ne.s32.totalorder %s1152_s5, %s901_s3  ;;  %s906_s6 = sshll.u32 %s1048_s4, 4  ;;  %s907_s6 = int_to_ptr.vmem [resolvable:$false] %s906_s6 }
  0x2c   : > { %s908_s7 = scalar_lea.vmem %s907_s6, 4096  ;;  %p909_p11 = scmp.lt.s32.totalorder %s1152_s5, %s907_s6 }
  0x2d   : > { %p904_p12 = pnand %p902_p9, %p888_p13  ;;  %p910_p2 = scmp.lt.s32.totalorder %s908_s7, %s901_s3 }
  0x2f   : > { %p905_p0 = pneg %p904_p12  ;;  %p911_p3 = por %p910_p2, %p909_p11 }
  0x31   : > { %p912_p4 = pnand %p911_p3, %p905_p0 }
  0x33   : > { %915 = shalt.err (!%p912_p4)
}
  0x34   : > { %s1049_s21 = smov 256   ;;  %s1050_s24 = smov 128  }
  0x35   : > { %s1051_s25 = smov 8   ;;  %p170_p11 = scmp.lt.s32.totalorder %s1046_s16, 5 }
  0x36   : > { %742 = dma.hbm_to_vmem [thread:$0]  (!%p1158_p10), %s1150_s8, 2048, %s1152_s5, %s127_s20, %s1049_s21, %s1050_s24, %s1051_s25  }
  0x37   : > { %s730_s22 = sshll.u32 %s1042_s15, 5  ;;  %p1566_p1 = scmp.ge.s32.totalorder %s1046_s16, 1 }
  0x38   : > { %s159_s30 = sadd.s32 %s1038_s14, %s730_s22  ;;  %s153_s4 = scalar_lea.vmem [#allocation8], %s713_s27 }
  0x39   : > { %p1198_p5 = pnand %p1566_p1, %p170_p11  ;;  %s720_s3 = sshll.u32 %s159_s30, 7 }
  0x3a   : > { %s162_s6 = sshll.u32 %s153_s4, 4  ;;  %s1208_s0 = scalar_lea.hbm %s1557_s1, %s720_s3  ;;  %s1210_s6 = int_to_ptr.vmem [resolvable:$true] %s162_s6 }
  0x3b   : > { %s150_s5 = scalar_lea.sflag [#allocation9], %s1137_s26  ;;  %s916_s8 = scalar_lea.hbm %s1208_s0, 2048 }
  0x3c   : > { %p917_p6 = scmp.ne.s32.totalorder %s1208_s0, %s916_s8  ;;  %s921_s22 = scalar_lea.hbm %s1557_s1, 8192 }
  0x3d   : > { %p922_p12 = scmp.lt.u32.totalorder %s1208_s0, %s1557_s1  ;;  %p923_p0 = scmp.lt.u32.totalorder %s921_s22, %s916_s8 }
  0x3e   : > { %p919_p8 = pnand %p917_p6, %p888_p13  ;;  %p925_p3 = scmp.lt.u32.totalorder %s916_s8, %s1208_s0 }
  0x3f   : > { %p924_p2 = por %p923_p0, %p922_p12 }
  0x40   : > { %p920_p9 = pneg %p919_p8 }
  0x41   : > { %p926_p4 = por %p925_p3, %p924_p2 }
  0x43   : > { %p927_p11 = pnand %p926_p4, %p920_p9 }
  0x45   : > { %930 = shalt.err (!%p927_p11)
}
  0x46   : > { %s931_s3 = scalar_lea.vmem %s1210_s6, 2048  ;;  %s1052_s4 = smov [#allocation8]  }
  0x47   : > { %p932_p1 = scmp.ne.s32.totalorder %s1210_s6, %s931_s3  ;;  %s936_s7 = sshll.u32 %s1052_s4, 4  ;;  %s937_s7 = int_to_ptr.vmem [resolvable:$false] %s936_s7 }
  0x48   : > { %s938_s27 = scalar_lea.vmem %s937_s7, 4096  ;;  %p939_p7 = scmp.lt.s32.totalorder %s1210_s6, %s937_s7 }
  0x49   : > { %p934_p6 = pnand %p932_p1, %p888_p13  ;;  %p940_p12 = scmp.lt.s32.totalorder %s938_s27, %s931_s3 }
  0x4b   : > { %p935_p8 = pneg %p934_p6  ;;  %p941_p0 = por %p940_p12, %p939_p7 }
  0x4d   : > { %p942_p2 = pnand %p941_p0, %p935_p8 }
  0x4f   : > { %945 = shalt.err (!%p942_p2)
}
  0x50   : > { %745 = dma.hbm_to_vmem [thread:$0]  (!%p1158_p10), %s1208_s0, 2048, %s1210_s6, %s150_s5, %s1049_s21, %s1050_s24, %s1051_s25  }
  0x51   : > { %174 = sbr.rel (%p1198_p5) target bundleno = 529 (0x211), region = 28  ;;  %s176_s8 = sand.u32 (!%p1198_p5), 1, %s1022_s10  }
  0x52   : > { %s722_s20 = sshll.u32 (!%p1198_p5), %s176_s8, 7  ;;  %s177_s22 = scalar_lea.sflag (!%p1198_p5), [#allocation6], %s176_s8 }
  0x53   : > { %s1244_s17 = scalar_lea.vmem (!%p1198_p5), [#allocation5], %s722_s20  ;;  %p1568_p7 = scmp.ne.s32.totalorder (!%p1198_p5), %s1563_s23, 0 }
  0x58   : > { %1005 = dma.done.wait (%p1568_p7), %s177_s22, 2048  }
  0x59   : > { %1007 = vsyncadd (%p1568_p7), %s177_s22, 4294965248  ;;  %s186_s26 = scalar_lea.sflag [#allocation9], %s176_s8  ;;  %s1250_s9 = scalar_lea.vmem [#allocation8], %s722_s20 }
  0x5a   : > { %1009 = dma.done.wait (%p1568_p7), %s186_s26, 2048  }
  0x5b   : > { %1011 = vsyncadd (%p1568_p7), %s186_s26, 4294965248  ;;  %p212_p10 = scmp.eq.s32.totalorder %s1034_s13, 0  ;;  %p213_p13 = scmp.eq.s32.totalorder %s1030_s12, 0 }
  0x5d   : > { %p214_p5 = pnand %p213_p13, %p212_p10 }
  0x5e   : > { %v1053_v0 = vmov (!%p214_p5), 0.0  }
  0x5f   : > { %217 = sbr.rel (%p214_p5) target bundleno = 102 (0x66), region = 40  ;;  %218 = vst [vmem:[#allocation2] sm:$0x1] (!%p214_p5), %v1053_v0  ;;  %219 = vst [vmem:[#allocation3] sm:$0x1] (!%p214_p5), %v1053_v0 }
  0x60   : > { %220 = vst [vmem:[#allocation4] sm:$0x1] (!%p214_p5), %v1053_v0 }
  0x66 PF: > { %v221_v1 = vld [vmem:[%s1244_s17] sm:$0xff]  ;;  %v222_v2 = vld [vmem:[%s1244_s17 + $0x8] sm:$0xff]  ;;  %v223_v3 = vld [vmem:[%s1244_s17 + $0x10] sm:$0xff]  ;;  %p581_p9 = scmp.eq.s32.totalorder %s1034_s13, 1  ;;  %p582_p3 = scmp.eq.s32.totalorder %s1030_s12, 1 }
  0x67   : > { %237 = vxpose.xlu0.b32.start [1/16] %v221_v1, 128  ;;  %v224_v4 = vld [vmem:[%s1244_s17 + $0x18] sm:$0xff]  ;;  %v225_v5 = vld [vmem:[%s1244_s17 + $0x20] sm:$0xff]  ;;  %v226_v6 = vld [vmem:[%s1244_s17 + $0x28] sm:$0xff] }
  0x68   : > { %v227_v7 = vld [vmem:[%s1244_s17 + $0x30] sm:$0xff]  ;;  %v228_v8 = vld [vmem:[%s1244_s17 + $0x38] sm:$0xff]  ;;  %v229_v9 = vld [vmem:[%s1244_s17 + $0x40] sm:$0xff]  ;;  %p1340_p4 = pnand %p582_p3, %p581_p9 }
  0x69   : > { %v230_v10 = vld [vmem:[%s1244_s17 + $0x48] sm:$0xff]  ;;  %v231_v11 = vld [vmem:[%s1244_s17 + $0x50] sm:$0xff]  ;;  %v232_v12 = vld [vmem:[%s1244_s17 + $0x58] sm:$0xff]  ;;  %vm588_vm0 = vcmask (!%p1340_p4), 1040384   ;;  %vm612_vm1 = vcmask (!%p1340_p4), 0  }
  0x6a   : > { %v1271_v13 = vld [vmem:[%s1250_s9] sm:$0xff]  ;;  %v1274_v14 = vld [vmem:[%s1250_s9 + $0x8] sm:$0xff]  ;;  %v1280_v17 = vld [vmem:[%s1250_s9 + $0x10] sm:$0xff] }
  0x6b   : > { %238 = vxpose.xlu0.b32.cont [2/16] %v222_v2, 128  ;;  %v558_v15 = vadd.f32 %v1274_v14, %v1271_v13  ;;  %v233_v16 = vld [vmem:[%s1244_s17 + $0x60] sm:$0xff]  ;;  %v234_v19 = vld [vmem:[%s1244_s17 + $0x68] sm:$0xff]  ;;  %v1285_v20 = vld [vmem:[%s1250_s9 + $0x18] sm:$0xff] }
  0x6c   : > { %v235_v22 = vld [vmem:[%s1244_s17 + $0x70] sm:$0xff]  ;;  %v1290_v23 = vld [vmem:[%s1250_s9 + $0x20] sm:$0xff]  ;;  %v236_v25 = vld [vmem:[%s1244_s17 + $0x78] sm:$0xff] }
  0x6d   : > { %v559_v18 = vadd.f32 %v558_v15, %v1280_v17  ;;  %v1295_v26 = vld [vmem:[%s1250_s9 + $0x28] sm:$0xff]  ;;  %v1299_v28 = vld [vmem:[%s1250_s9 + $0x30] sm:$0xff]  ;;  %v1303_v30 = vld [vmem:[%s1250_s9 + $0x38] sm:$0xff] }
  0x6e   : > { %v1307_v32 = vld [vmem:[%s1250_s9 + $0x40] sm:$0xff]  ;;  %v1311_v34 = vld [vmem:[%s1250_s9 + $0x48] sm:$0xff]  ;;  %v1315_v36 = vld [vmem:[%s1250_s9 + $0x50] sm:$0xff] }
  0x6f   : > { %239 = vxpose.xlu0.b32.cont [3/16] %v223_v3, 128  ;;  %v560_v21 = vadd.f32 %v559_v18, %v1285_v20  ;;  %v1319_v38 = vld [vmem:[%s1250_s9 + $0x58] sm:$0xff]  ;;  %v1323_v40 = vld [vmem:[%s1250_s9 + $0x60] sm:$0xff]  ;;  %v1327_v42 = vld [vmem:[%s1250_s9 + $0x68] sm:$0xff] }
  0x70   : > { %v1331_v44 = vld [vmem:[%s1250_s9 + $0x70] sm:$0xff]  ;;  %v1335_v46 = vld [vmem:[%s1250_s9 + $0x78] sm:$0xff] }
  0x71   : > { %v561_v24 = vadd.f32 %v560_v21, %v1290_v23  ;;  %v557_v54 = vld [vmem:[#allocation4] sm:$0x1] }
  0x73   : > { %240 = vxpose.xlu0.b32.cont [4/16] %v224_v4, 128  ;;  %v562_v27 = vadd.f32 %v561_v24, %v1295_v26 }
  0x75   : > { %v563_v29 = vadd.f32 %v562_v27, %v1299_v28 }
  0x77   : > { %241 = vxpose.xlu0.b32.cont [5/16] %v225_v5, 128  ;;  %v564_v31 = vadd.f32 %v563_v29, %v1303_v30 }
  0x79   : > { %v565_v33 = vadd.f32 %v564_v31, %v1307_v32 }
  0x7b   : > { %242 = vxpose.xlu0.b32.cont [6/16] %v226_v6, 128  ;;  %v566_v35 = vadd.f32 %v565_v33, %v1311_v34 }
  0x7d   : > { %v567_v37 = vadd.f32 %v566_v35, %v1315_v36 }
  0x7f   : > { %243 = vxpose.xlu0.b32.cont [7/16] %v227_v7, 128  ;;  %v568_v39 = vadd.f32 %v567_v37, %v1319_v38 }
  0x81   : > { %v569_v41 = vadd.f32 %v568_v39, %v1323_v40 }
  0x83   : > { %244 = vxpose.xlu0.b32.cont [8/16] %v228_v8, 128  ;;  %v570_v43 = vadd.f32 %v569_v41, %v1327_v42 }
  0x85   : > { %v571_v45 = vadd.f32 %v570_v43, %v1331_v44 }
  0x87   : > { %245 = vxpose.xlu0.b32.cont [9/16] %v229_v9, 128  ;;  %v572_v47 = vadd.f32 %v571_v45, %v1335_v46 }
  0x89   : > { %v573_v48 = vrot.slane %v572_v47, 4 }
  0x8b   : > { %246 = vxpose.xlu0.b32.cont [10/16] %v230_v10, 128  ;;  %v574_v49 = vadd.f32 %v573_v48, %v572_v47 }
  0x8d   : > { %v575_v50 = vrot.slane %v574_v49, 2 }
  0x8f   : > { %247 = vxpose.xlu0.b32.cont [11/16] %v231_v11, 128  ;;  %v576_v51 = vadd.f32 %v575_v50, %v574_v49 }
  0x91   : > { %v577_v52 = vrot.slane %v576_v51, 1 }
  0x93   : > { %248 = vxpose.xlu0.b32.cont [12/16] %v232_v12, 128  ;;  %v578_v53 = vadd.f32 %v577_v52, %v576_v51 }
  0x95   : > { %v579_v55 = vadd.f32 %v578_v53, %v557_v54 }
  0x97   : > { %249 = vxpose.xlu0.b32.cont [13/16] %v233_v16, 128  ;;  %580 = vst [vmem:[#allocation4] sm:$0x1] %v579_v55 }
  0x9b   : > { %250 = vxpose.xlu0.b32.cont [14/16] %v234_v19, 128 }
  0x9f   : > { %251 = vxpose.xlu0.b32.cont [15/16] %v235_v22, 128 }
  0xa3   : > { %252 = vxpose.xlu0.b32.end [16/16] %v236_v25, 128 }
  0xe7   : > { %v1344_v56 = vpop.trf.xlu0 }
  0xe8   : > { %v317_v59 = vand.u32 2147483647, %v1344_v56 }
  0xea   : > { %v333_v62 = vsub.f32 0.0, %v317_v59  ;;  %v445_v59 = vsub.f32 1.0, %v1271_v13 }
  0xeb   : > { %v1346_v57 = vpop.trf.xlu0 }
  0xec   : > { %v318_v61 = vand.u32 2147483647, %v1346_v57  ;;  %v349_v3 = vmul.f32 1.442695, %v333_v62  ;;  %v447_v62 = vsub.f32 1.0, %v1280_v17 }
  0xee   : > { %v334_v1 = vsub.f32 0.0, %v318_v61  ;;  %818 = vpow2.f32 %v349_v3  ;;  %v446_v61 = vsub.f32 1.0, %v1274_v14  ;;  %v448_v3 = vsub.f32 1.0, %v1285_v20 }
  0xef   : > { %v1348_v58 = vpop.trf.xlu0 }
  0xf0   : > { %v319_v63 = vand.u32 2147483647, %v1348_v58  ;;  %v351_v7 = vmul.f32 1.442695, %v334_v1 }
  0xf2   : > { %v335_v4 = vsub.f32 0.0, %v319_v63  ;;  %820 = vpow2.f32 %v351_v7 }
  0xf3   : > { %v1351_v60 = vpop.trf.xlu0 }
  0xf4   : > { %v320_v2 = vand.u32 2147483647, %v1351_v60  ;;  %v353_v10 = vmul.f32 1.442695, %v335_v4  ;;  %v449_v4 = vsub.f32 1.0, %v1290_v23 }
  0xf6   : > { %v336_v8 = vsub.f32 0.0, %v320_v2  ;;  %822 = vpow2.f32 %v353_v10 }
  0xf7   : > { %v1355_v0 = vpop.trf.xlu0 }
  0xf8   : > { %v321_v5 = vand.u32 2147483647, %v1355_v0  ;;  %v355_v16 = vmul.f32 1.442695, %v336_v8  ;;  %v819_v31 = vpop.eup %818 }
  0xf9   : > { %v381_v41 = vadd.f32 1.0, %v819_v31  ;;  %v286_v31 = vsub.f32 0.0, %v1346_v57 }
  0xfa   : > { %v337_v11 = vsub.f32 0.0, %v321_v5  ;;  %824 = vpow2.f32 %v355_v16  ;;  %v450_v5 = vsub.f32 1.0, %v1295_v26  ;;  %v452_v16 = vsub.f32 1.0, %v1303_v30 }
  0xfb   : > { %v1359_v6 = vpop.trf.xlu0 }
  0xfc   : > { %v322_v9 = vand.u32 2147483647, %v1359_v6  ;;  %v357_v19 = vmul.f32 1.442695, %v337_v11  ;;  %v821_v39 = vpop.eup %820 }
  0xfd   : > { %v382_v49 = vadd.f32 1.0, %v821_v39  ;;  %v287_v39 = vsub.f32 0.0, %v1348_v58 }
  0xfe   : > { %v338_v18 = vsub.f32 0.0, %v322_v9  ;;  %826 = vpow2.f32 %v357_v19  ;;  %v451_v9 = vsub.f32 1.0, %v1299_v28 }
  0xff   : > { %v1362_v12 = vpop.trf.xlu0 }
 0x100   : > { %v323_v15 = vand.u32 2147483647, %v1362_v12  ;;  %v359_v25 = vmul.f32 1.442695, %v338_v18  ;;  %v823_v47 = vpop.eup %822  ;;  %v453_v18 = vsub.f32 1.0, %v1307_v32 }
 0x101   : > { %v383_v52 = vadd.f32 1.0, %v823_v47 }
 0x102   : > { %v339_v22 = vsub.f32 0.0, %v323_v15  ;;  %828 = vpow2.f32 %v359_v25  ;;  %v285_v15 = vsub.f32 0.0, %v1344_v56 }
 0x103   : > { %v1365_v21 = vpop.trf.xlu0 }
 0x104   : > { %v324_v24 = vand.u32 2147483647, %v1365_v21  ;;  %v361_v33 = vmul.f32 1.442695, %v339_v22  ;;  %v825_v51 = vpop.eup %824 }
 0x105   : > { %v384_v2 = vadd.f32 1.0, %v825_v51 }
 0x106   : > { %v340_v27 = vsub.f32 0.0, %v324_v24  ;;  %830 = vpow2.f32 %v361_v33 }
 0x107   : > { %v1368_v29 = vpop.trf.xlu0 }
 0x108   : > { %v325_v35 = vand.u32 2147483647, %v1368_v29  ;;  %v363_v37 = vmul.f32 1.442695, %v340_v27  ;;  %v827_v55 = vpop.eup %826 }
 0x109   : > { %v385_v8 = vadd.f32 1.0, %v827_v55 }
 0x10a   : > { %v341_v43 = vsub.f32 0.0, %v325_v35  ;;  %832 = vpow2.f32 %v363_v37 }
 0x10b   : > { %v1371_v45 = vpop.trf.xlu0  ;;  %834 = vlog2.f32 %v381_v41 }
 0x10c   : > { %v326_v48 = vand.u32 2147483647, %v1371_v45  ;;  %v365_v50 = vmul.f32 1.442695, %v341_v43  ;;  %v829_v7 = vpop.eup %828 }
 0x10d   : > { %v386_v33 = vadd.f32 1.0, %v829_v7  ;;  %v1407_v7 = vmul.f32 %v447_v62, %v1348_v58  ;;  %v290_v58 = vsub.f32 0.0, %v1359_v6 }
 0x10e   : > { %v342_v53 = vsub.f32 0.0, %v326_v48  ;;  %836 = vpow2.f32 %v365_v50  ;;  %v301_v48 = vmax.f32 %v285_v15, 0.0  ;;  %v288_v50 = vsub.f32 0.0, %v1351_v60 }
 0x10f   : > { %v1374_v54 = vpop.trf.xlu0  ;;  %838 = vlog2.f32 %v382_v49  ;;  %v1399_v49 = vmul.f32 %v445_v59, %v1344_v56  ;;  %v303_v59 = vmax.f32 %v287_v39, 0.0  ;;  %v306_v47 = vmax.f32 %v290_v58, 0.0 }
 0x110   : > { %v367_v63 = vmul.f32 1.442695, %v342_v53  ;;  %v327_v1 = vand.u32 2147483647, %v1374_v54  ;;  %840 = vlog2.f32 %v383_v52  ;;  %v831_v27 = vpop.eup %830  ;;  %v1403_v52 = vmul.f32 %v446_v61, %v1346_v57 }
 0x111   : > { %v387_v53 = vadd.f32 1.0, %v831_v27  ;;  %v304_v57 = vmax.f32 %v288_v50, 0.0  ;;  %v1413_v61 = vmul.f32 %v448_v3, %v1351_v60 }
 0x112   : > { %v343_v10 = vsub.f32 0.0, %v327_v1  ;;  %842 = vpow2.f32 %v367_v63 }
 0x113   : > { %v1384_v11 = vpop.trf.xlu0  ;;  %844 = vlog2.f32 %v384_v2  ;;  %v302_v2 = vmax.f32 %v286_v31, 0.0 }
 0x114   : > { %v369_v22 = vmul.f32 1.442695, %v343_v10  ;;  %v328_v25 = vand.u32 2147483647, %v1384_v11  ;;  %v833_v37 = vpop.eup %832  ;;  %846 = vlog2.f32 %v385_v8  ;;  %v289_v10 = vsub.f32 0.0, %v1355_v0 }
 0x115   : > { %v835_v51 = vpop.eup %834  ;;  %v388_v8 = vadd.f32 1.0, %v833_v37 }
 0x116   : > { %v344_v41 = vsub.f32 0.0, %v328_v25  ;;  %848 = vpow2.f32 %v369_v22  ;;  %v1416_v25 = vmul.f32 %v449_v4, %v1355_v0  ;;  %v398_v39 = vmul.f32 0.6931472, %v835_v51 }
 0x117   : > { %v1395_v43 = vpop.trf.xlu0  ;;  %850 = vlog2.f32 %v386_v33  ;;  %v305_v50 = vmax.f32 %v289_v10, 0.0  ;;  %v292_v51 = vsub.f32 0.0, %v1365_v21 }
 0x118   : > { %v371_v55 = vmul.f32 1.442695, %v344_v41  ;;  %v329_v63 = vand.u32 2147483647, %v1395_v43  ;;  %v837_v1 = vpop.eup %836 }
 0x119   : > { %v839_v56 = vpop.eup %838  ;;  %v389_v27 = vadd.f32 1.0, %v837_v1  ;;  %v308_v19 = vmax.f32 %v292_v51, 0.0 }
 0x11a   : > { %852 = vpow2.f32 %v371_v55  ;;  %v345_v15 = vsub.f32 0.0, %v329_v63  ;;  %v841_v62 = vpop.eup %840  ;;  %v400_v41 = vmul.f32 0.6931472, %v839_v56  ;;  %v291_v55 = vsub.f32 0.0, %v1362_v12 }
 0x11b   : > { %v1410_v22 = vpop.trf.xlu0  ;;  %854 = vlog2.f32 %v387_v53  ;;  %v402_v63 = vmul.f32 0.6931472, %v841_v62  ;;  %v1426_v53 = vmul.f32 %v450_v5, %v1359_v6  ;;  %v429_v62 = vadd.f32 %v398_v39, %v301_v48 }
 0x11c   : > { %v373_v31 = vmul.f32 1.442695, %v345_v15  ;;  %v330_v33 = vand.u32 2147483647, %v1410_v22  ;;  %v843_v37 = vpop.eup %842  ;;  %856 = vlog2.f32 %v388_v8  ;;  %v1432_v8 = vmul.f32 %v451_v9, %v1362_v12 }
 0x11d   : > { %v390_v60 = vadd.f32 1.0, %v843_v37  ;;  %v845_v4 = vpop.eup %844  ;;  %v430_v58 = vadd.f32 %v400_v41, %v302_v2  ;;  %v431_v24 = vadd.f32 %v402_v63, %v303_v59  ;;  %v1440_v12 = vmul.f32 %v452_v16, %v1365_v21 }
 0x11e   : > { %858 = vpow2.f32 %v373_v31  ;;  %v346_v3 = vsub.f32 0.0, %v330_v33  ;;  %v847_v1 = vpop.eup %846  ;;  %v307_v31 = vmax.f32 %v291_v55, 0.0  ;;  %v404_v33 = vmul.f32 0.6931472, %v845_v4 }
 0x11f   : > { %v1421_v0 = vpop.trf.xlu0  ;;  %860 = vlog2.f32 %v389_v27  ;;  %v293_v9 = vsub.f32 0.0, %v1368_v29  ;;  %v406_v2 = vmul.f32 0.6931472, %v847_v1  ;;  %v477_v41 = vadd.f32 %v1399_v49, %v429_v62 }
 0x120   : > { %v375_v56 = vmul.f32 1.442695, %v346_v3  ;;  %v331_v10 = vand.u32 2147483647, %v1421_v0  ;;  %v849_v15 = vpop.eup %848  ;;  %862 = vlog2.f32 %v390_v60  ;;  %v478_v55 = vadd.f32 %v1403_v52, %v430_v58 }
 0x121   : > { %v391_v6 = vadd.f32 1.0, %v849_v15  ;;  %v851_v35 = vpop.eup %850  ;;  %v1449_v59 = vmul.f32 %v453_v18, %v1368_v29  ;;  %v432_v16 = vadd.f32 %v404_v33, %v304_v57  ;;  %v493_v51 = vmul.f32 %v429_v62, %v1271_v13 }
 0x122   : > { %864 = vpow2.f32 %v375_v56  ;;  %v347_v5 = vsub.f32 0.0, %v331_v10  ;;  %v408_v3 = vmul.f32 0.6931472, %v851_v35  ;;  %v309_v1 = vmax.f32 %v293_v9, 0.0 }
 0x123   : > { %v1435_v37 = vpop.trf.xlu0  ;;  %866 = vlog2.f32 %v391_v6  ;;  %v294_v56 = vsub.f32 0.0, %v1371_v45  ;;  %v494_v52 = vmul.f32 %v430_v58, %v1274_v14  ;;  %v479_v10 = vadd.f32 %v1407_v7, %v431_v24 }
 0x124   : > { %v853_v48 = vpop.eup %852  ;;  %v377_v27 = vmul.f32 1.442695, %v347_v5  ;;  %v332_v39 = vand.u32 2147483647, %v1435_v37  ;;  %v433_v29 = vadd.f32 %v406_v2, %v305_v50  ;;  %v510_v15 = vadd.f32 %v478_v55, %v477_v41 }
 0x125   : > { %v392_v60 = vadd.f32 1.0, %v853_v48  ;;  %v855_v21 = vpop.eup %854  ;;  %v1570_v35 = vsub.f32 1.0, %v1311_v34  ;;  %v495_v62 = vmul.f32 %v431_v24, %v1280_v17  ;;  %v480_v5 = vadd.f32 %v1413_v61, %v432_v16 }
 0x126   : > { %868 = vpow2.f32 %v377_v27  ;;  %v348_v4 = vsub.f32 0.0, %v332_v39  ;;  %v857_v63 = vpop.eup %856  ;;  %v410_v6 = vmul.f32 0.6931472, %v855_v21  ;;  %v434_v9 = vadd.f32 %v408_v3, %v306_v47 }
 0x127   : > { %870 = vlog2.f32 %v392_v60  ;;  %v1458_v57 = vmul.f32 %v1570_v35, %v1371_v45  ;;  %v412_v58 = vmul.f32 0.6931472, %v857_v63  ;;  %v310_v7 = vmax.f32 %v294_v56, 0.0 }
 0x128   : > { %v859_v49 = vpop.eup %858  ;;  %v379_v18 = vmul.f32 1.442695, %v348_v4  ;;  %v295_v50 = vsub.f32 0.0, %v1374_v54  ;;  %v534_v2 = vadd.f32 %v494_v52, %v493_v51  ;;  %v511_v27 = vadd.f32 %v510_v15, %v479_v10 }
 0x129   : > { %v393_v33 = vadd.f32 1.0, %v859_v49  ;;  %v861_v13 = vpop.eup %860  ;;  %v496_v45 = vmul.f32 %v432_v16, %v1285_v20  ;;  %v481_v39 = vadd.f32 %v1416_v25, %v433_v29  ;;  %v435_v41 = vadd.f32 %v410_v6, %v307_v31 }
 0x12a   : > { %872 = vpow2.f32 %v379_v18  ;;  %v863_v14 = vpop.eup %862  ;;  %v414_v55 = vmul.f32 0.6931472, %v861_v13  ;;  %v1571_v17 = vsub.f32 1.0, %v1315_v36  ;;  %v535_v60 = vadd.f32 %v534_v2, %v495_v62 }
 0x12b   : > { %874 = vlog2.f32 %v393_v33  ;;  %v512_v21 = vadd.f32 %v511_v27, %v480_v5  ;;  %v497_v3 = vmul.f32 %v433_v29, %v1290_v23  ;;  %v482_v4 = vadd.f32 %v1426_v53, %v434_v9 }
 0x12c   : > { %v865_v48 = vpop.eup %864  ;;  %v471_v24 = vmul.f32 %v1571_v17, %v1374_v54  ;;  %v436_v63 = vadd.f32 %v412_v58, %v308_v19  ;;  %v416_v51 = vmul.f32 0.6931472, %v863_v14  ;;  %v311_v56 = vmax.f32 %v295_v50, 0.0 }
 0x12d   : > { %v394_v47 = vadd.f32 1.0, %v865_v48  ;;  %v867_v61 = vpop.eup %866  ;;  %v536_v25 = vadd.f32 %v535_v60, %v496_v45  ;;  %v513_v31 = vadd.f32 %v512_v21, %v481_v39  ;;  %v498_v16 = vmul.f32 %v434_v9, %v1295_v26 }
 0x12e   : > { %v296_v49 = vsub.f32 0.0, %v1384_v11  ;;  %v483_v52 = vadd.f32 %v1432_v8, %v435_v41  ;;  %v437_v10 = vadd.f32 %v414_v55, %v309_v1  ;;  %v418_v18 = vmul.f32 0.6931472, %v867_v61 }
 0x12f   : > { %876 = vlog2.f32 %v394_v47  ;;  %v537_v23 = vadd.f32 %v536_v25, %v497_v3  ;;  %v514_v29 = vadd.f32 %v513_v31, %v482_v4  ;;  %v499_v19 = vmul.f32 %v435_v41, %v1299_v28 }
 0x130   : > { %v869_v20 = vpop.eup %868  ;;  %v297_v53 = vsub.f32 0.0, %v1395_v43  ;;  %v484_v6 = vadd.f32 %v1440_v12, %v436_v63  ;;  %v438_v35 = vadd.f32 %v416_v51, %v310_v7  ;;  %v500_v62 = vmul.f32 %v436_v63, %v1303_v30 }
 0x131   : > { %v871_v54 = vpop.eup %870  ;;  %v395_v15 = vadd.f32 1.0, %v869_v20  ;;  %v538_v13 = vadd.f32 %v537_v23, %v498_v16  ;;  %v312_v5 = vmax.f32 %v296_v49, 0.0  ;;  %v298_v8 = vsub.f32 0.0, %v1410_v22 }
 0x132   : > { %v420_v33 = vmul.f32 0.6931472, %v871_v54  ;;  %v515_v9 = vadd.f32 %v514_v29, %v483_v52  ;;  %v485_v14 = vadd.f32 %v1449_v59, %v437_v10  ;;  %v439_v58 = vadd.f32 %v418_v18, %v311_v56 }
 0x133   : > { %878 = vlog2.f32 %v395_v15  ;;  %v539_v50 = vadd.f32 %v538_v13, %v499_v19  ;;  %v501_v48 = vmul.f32 %v437_v10, %v1307_v32  ;;  %v313_v12 = vmax.f32 %v297_v53, 0.0 }
 0x134   : > { %v873_v26 = vpop.eup %872  ;;  %v516_v2 = vadd.f32 %v515_v9, %v484_v6  ;;  %v486_v27 = vadd.f32 %v1458_v57, %v438_v35  ;;  %v440_v45 = vadd.f32 %v420_v33, %v312_v5  ;;  %v502_v39 = vmul.f32 %v438_v35, %v1311_v34 }
 0x135   : > { %v875_v1 = vpop.eup %874  ;;  %v396_v28 = vadd.f32 1.0, %v873_v26  ;;  %v540_v30 = vadd.f32 %v539_v50, %v500_v62  ;;  %v1572_v41 = vsub.f32 1.0, %v1319_v38  ;;  %v458_v59 = vsub.f32 1.0, %v1327_v42 }
 0x136   : > { %v422_v7 = vmul.f32 0.6931472, %v875_v1  ;;  %v517_v47 = vadd.f32 %v516_v2, %v485_v14  ;;  %v487_v61 = vadd.f32 %v471_v24, %v439_v58  ;;  %v314_v60 = vmax.f32 %v298_v8, 0.0 }
 0x137   : > { %880 = vlog2.f32 %v396_v28  ;;  %v472_v55 = vmul.f32 %v1572_v41, %v1384_v11  ;;  %v541_v21 = vadd.f32 %v540_v30, %v501_v48  ;;  %v503_v3 = vmul.f32 %v439_v58, %v1315_v36 }
 0x138   : > { %v441_v32 = vadd.f32 %v422_v7, %v313_v12  ;;  %v299_v4 = vsub.f32 0.0, %v1421_v0  ;;  %v518_v63 = vadd.f32 %v517_v47, %v486_v27  ;;  %v1573_v34 = vsub.f32 1.0, %v1323_v40 }
 0x139   : > { %v877_v17 = vpop.eup %876  ;;  %v488_v51 = vadd.f32 %v472_v55, %v440_v45  ;;  %v459_v11 = vsub.f32 1.0, %v1331_v44  ;;  %v542_v20 = vadd.f32 %v541_v21, %v502_v39  ;;  %v504_v25 = vmul.f32 %v440_v45, %v1319_v38  ;;  %v509_v55 = vld [vmem:[#allocation2] sm:$0x1] }
 0x13a   : > { %v424_v57 = vmul.f32 0.6931472, %v877_v17  ;;  %v473_v56 = vmul.f32 %v1573_v34, %v1395_v43  ;;  %v519_v16 = vadd.f32 %v518_v63, %v487_v61  ;;  %v474_v36 = vmul.f32 %v458_v59, %v1410_v22  ;;  %v533_v59 = vld [vmem:[#allocation3] sm:$0x1] }
 0x13b   : > { %v300_v54 = vsub.f32 0.0, %v1435_v37  ;;  %v543_v52 = vadd.f32 %v542_v20, %v503_v3  ;;  %v505_v10 = vmul.f32 %v441_v32, %v1323_v40  ;;  %v315_v18 = vmax.f32 %v299_v4, 0.0 }
 0x13c   : > { %v442_v24 = vadd.f32 %v424_v57, %v314_v60  ;;  %v489_v49 = vadd.f32 %v473_v56, %v441_v32  ;;  %v520_v23 = vadd.f32 %v519_v16, %v488_v51  ;;  %v475_v43 = vmul.f32 %v459_v11, %v1421_v0 }
 0x13d   : > { %v879_v31 = vpop.eup %878  ;;  %v460_v29 = vsub.f32 1.0, %v1335_v46  ;;  %v544_v19 = vadd.f32 %v543_v52, %v504_v25  ;;  %v316_v22 = vmax.f32 %v300_v54, 0.0 }
 0x13e   : > { %v426_v15 = vmul.f32 0.6931472, %v879_v31  ;;  %v490_v38 = vadd.f32 %v474_v36, %v442_v24  ;;  %v506_v53 = vmul.f32 %v442_v24, %v1327_v42  ;;  %v521_v33 = vadd.f32 %v520_v23, %v489_v49 }
 0x13f   : > { %v545_v26 = vadd.f32 %v544_v19, %v505_v10  ;;  %v476_v0 = vmul.f32 %v460_v29, %v1435_v37 }
 0x140   : > { %v443_v6 = vadd.f32 %v426_v15, %v315_v18  ;;  %v522_v5 = vadd.f32 %v521_v33, %v490_v38 }
 0x141   : > { %v881_v35 = vpop.eup %880  ;;  %v546_v8 = vadd.f32 %v545_v26, %v506_v53 }
 0x142   : > { %v491_v13 = vadd.f32 %v475_v43, %v443_v6  ;;  %v507_v62 = vmul.f32 %v443_v6, %v1331_v44  ;;  %v428_v40 = vmul.f32 0.6931472, %v881_v35 }
 0x144   : > { %v444_v1 = vadd.f32 %v428_v40, %v316_v22  ;;  %v523_v9 = vadd.f32 %v522_v5, %v491_v13  ;;  %v547_v14 = vadd.f32 %v546_v8, %v507_v62 }
 0x146   : > { %v492_v58 = vadd.f32 %v476_v0, %v444_v1  ;;  %v508_v28 = vmul.f32 %v444_v1, %v1335_v46  ;;  %v596_v46 = vld [vmem:[#allocation4] sm:$0x1] (!%p1340_p4) }
 0x147   : > { %v597_v60 = vsel (!%p1340_p4), %vm588_vm0, %v596_v46, 0.0 }
 0x148   : > { %v524_v42 = vadd.f32 %v523_v9, %v492_v58  ;;  %v548_v50 = vadd.f32 %v547_v14, %v508_v28  ;;  %598 = vadd.xlane.f32.xlu0 (!%p1340_p4), %v597_v60 }
 0x14a   : > { %v525_v48 = vrot.slane %v524_v42, 4  ;;  %v549_v12 = vrot.slane %v548_v50, 4 }
 0x14c   : > { %v526_v7 = vadd.f32 %v525_v48, %v524_v42  ;;  %v550_v2 = vadd.f32 %v549_v12, %v548_v50 }
 0x14e   : > { %v527_v27 = vrot.slane %v526_v7, 2  ;;  %v551_v45 = vrot.slane %v550_v2, 2 }
 0x150   : > { %v528_v44 = vadd.f32 %v527_v27, %v526_v7  ;;  %v552_v30 = vadd.f32 %v551_v45, %v550_v2 }
 0x152   : > { %v529_v39 = vrot.slane %v528_v44, 1  ;;  %v553_v41 = vrot.slane %v552_v30, 1  ;;  %586 = sbr.rel (%p1340_p4) target bundleno = 504 (0x1f8), region = 44 }
 0x154   : > { %v530_v37 = vadd.f32 %v529_v39, %v528_v44  ;;  %v554_v17 = vadd.f32 %v553_v41, %v552_v30 }
 0x156   : > { %v531_v47 = vadd.f32 %v530_v37, %v509_v55  ;;  %v555_v61 = vadd.f32 %v554_v17, %v533_v59 }
 0x158   : > { %532 = vst [vmem:[#allocation2] sm:$0x1] %v531_v47  ;;  %556 = vst [vmem:[#allocation3] sm:$0x1] %v555_v61 }
 0x15f   : > { %v592_v32 = vld [vmem:[#allocation3] sm:$0x1]  ;;  %v587_v21 = vld [vmem:[#allocation2] sm:$0x1] }
 0x160   : > { %v589_v3 = vsel %vm588_vm0, %v587_v21, 0.0  ;;  %v593_v57 = vsel %vm588_vm0, %v592_v32, 0.0 }
 0x161   : > { %590 = vadd.xlane.f32.xlu1 %v589_v3  ;;  %594 = vadd.xlane.f32.xlu0 %v593_v57 }
 0x1d5   : > { %v599_v4 = vpop.xlane.xlu0 %598 }
 0x1d6   : > { %v600_v63 = vsub.f32 65536.0, %v599_v4  ;;  %882 = vrcp.f32 %v599_v4 }
 0x1d8   : > { %v603_v51 = vmul.f32 2.0, %v600_v63 }
 0x1da   : > { %884 = vrcp.f32 %v603_v51 }
 0x1e0   : > { %v883_v34 = vpop.eup %882 }
 0x1e1   : > { %v602_v56 = vmul.f32 %v883_v34, %v600_v63 }
 0x1e3   : > { %v724_v20 = vadd.f32 -1.0, %v602_v56 }
 0x1e4   : > { %v885_v31 = vpop.eup %884 }
 0x1e5   : > { %v605_v49 = vmul.f32 65536.0, %v885_v31 }
 0x1ee   : > { %v595_v11 = vpop.xlane.xlu0 %594  ;;  %v591_v25 = vpop.xlane.xlu1 %590 }
 0x1ef   : > { %v607_v24 = vmul.f32 %v724_v20, %v595_v11 }
 0x1f1   : > { %v608_v16 = vadd.f32 %v607_v24, %v591_v25 }
 0x1f3   : > { %v610_v36 = vmul.f32 1.5258789e-05, %v608_v16 }
 0x1f5   : > { %v611_v54 = vmul.f32 %v610_v36, %v605_v49 }
 0x1f7   : > { %613 = vst.msk [vmem:[#allocation10] sm:$0x1] %vm612_vm1, %v611_v54 }
 0x1f8 PF: > { %s1574_s12 = sadd.s32 4294967295, %s1046_s16   ;;  %s1054_s23 = smov [#allocation10]  }
 0x1f9   : > { %p1506_p11 = scmp.eq.s32.totalorder %s1574_s12, 3  ;;  %s621_s21 = sshll.u32 %s1054_s23, 4  ;;  %s622_s21 = int_to_ptr.vmem [resolvable:$true] %s621_s21 }
 0x1fa   : > { %s946_s24 = scalar_lea.vmem %s622_s21, 16  ;;  %s952_s25 = scalar_lea.vmem %s622_s21, 32 }
 0x1fb   : > { %p947_p1 = scmp.ne.s32.totalorder %s622_s21, %s946_s24  ;;  %p953_p12 = scmp.lt.s32.totalorder %s622_s21, %s622_s21 }
 0x1fc   : > { %p954_p0 = scmp.lt.s32.totalorder %s952_s25, %s946_s24 }
 0x1fd   : > { %p948_p6 = pnand %p947_p1, %p1506_p11 }
 0x1fe   : > { %p955_p2 = por %p954_p0, %p953_p12 }
 0x1ff   : > { %p949_p8 = pneg %p948_p6 }
 0x201   : > { %p956_p7 = pnand %p955_p2, %p949_p8 }
 0x203   : > { %959 = shalt.err (!%p956_p7)
}
 0x204   : > { %s960_s5 = scalar_lea.hbm %s1558_s2, 16 }
 0x205   : > { %p961_p10 = scmp.ne.s32.totalorder %s1558_s2, %s960_s5  ;;  %p966_p9 = scmp.lt.u32.totalorder %s960_s5, %s1558_s2 }
 0x207   : > { %p962_p13 = pnand %p961_p10, %p1506_p11 }
 0x209   : > { %p963_p5 = pneg %p962_p13 }
 0x20b   : > { %p968_p3 = pnand %p966_p9, %p963_p5 }
 0x20d   : > { %971 = shalt.err (!%p968_p3)
}
 0x20e   : > { %736 = dma.vmem_to_hbm [thread:$0]  (%p1506_p11), %s622_s21, 16, %s1558_s2, [#allocation7]  }
 0x20f   : > { %1013 = dma.done.wait (%p1506_p11), [#allocation7], 16  }
 0x210   : > { %1015 = vsyncadd (%p1506_p11), [#allocation7], 4294967280 }
 0x211 PF: > { %s19_s16 = sadd.s32 1, %s1046_s16   ;;  %s1576_s9 = smov %s1022_s10 }
 0x212   : > { %p16_p4 = scmp.ge.s32.totalorder %s19_s16, 6   ;;  %s1577_s10 = smov %s1026_s11 }
 0x213   : > { %s1578_s11 = smov %s1142_s29  ;;  %s1579_s12 = smov %s1038_s14 }
 0x214   : > { %s1580_s13 = smov %s1042_s15  ;;  %s1581_s14 = smov %s1584_s18 }
 0x215   : > { %s1582_s15 = smov %s1588_s19  ;;  %18 = sbr.rel (!%p16_p4) target bundleno = 10 (0xa), region = 86 }
 0x21c   :  { %634 = vsyncpa [#allocation6], 1 }
 0x21d   :  { %636 = vsyncpa [#allocation6 + $0x1], 1 }
 0x21e   :  { %637 = vsyncpa [#allocation9], 1 }
 0x21f   :  { %639 = vsyncpa [#allocation9 + $0x1], 1 }
 0x220   :  { %640 = vsyncpa [#allocation7], 1 }
 0x221   :  { %642 = vsyncpa [#allocation7 + $0x1], 1 }

</bundles_post_ra>
